<compile_context>
chip_gen: v5e
topology: v5e:2x2
jax: 0.10.0
libtpu: 0.0.40
codegen_flags: <defaults>
</compile_context>

<pallas_src>
import functools

import jax
import jax.numpy as jnp
from jax import lax
from jax.experimental import pallas as pl
from jax.experimental.pallas import tpu as pltpu

LN_EPS = 1e-5     # nn.LayerNorm default
ROW_ALIGN = 16    # sublane alignment safe for bf16 x tiles


def _round_up(x, m):
    return ((x + m - 1) // m) * m


def _hw_info():
    """(vmem_capacity_bytes, tensorcores_per_chip) with safe fallbacks."""
    vmem_cap = 64 * 2**20          # conservative (v7x per-TC) fallback
    num_tc = 1
    try:
        info = pltpu.get_tpu_info()
        vmem_cap = int(info.vmem_capacity_bytes)
        for attr in ("num_tensorcores", "tensorcore_count", "num_cores"):
            v = getattr(info, attr, None)
            if v:
                num_tc = max(1, int(v))
                break
    except Exception:
        pass
    return vmem_cap, num_tc


def _footprint_bytes(tm, tk, d_pad):
    """Worst-case VMEM footprint of one pipelined step (double buffers)."""
    return (2 * tm * d_pad * 2        # x tiles (bf16, double-buffered)
            + 2 * d_pad * tk * 2      # w1 tiles (bf16)
            + 2 * tk * d_pad * 2      # w2 tiles (bf16)
            + 2 * 8 * tk * 4          # b1 tiles (sublane-padded f32)
            + 3 * 2 * 8 * d_pad * 4   # b2 / gamma / beta tiles
            + 2 * tm * d_pad * 4      # output tiles (f32, used as accumulator)
            + tm * tk * 4)            # h intermediate (worst case in VMEM)


def _tile_plan(n_rows, model_dim, inner_dim):
    """Choose (d_pad, k_pad, tm, tk) from the chip's VMEM budget."""
    d_pad = _round_up(model_dim, 128)
    k_full = _round_up(inner_dim, 128)
    vmem_cap, num_tc = _hw_info()
    budget = (vmem_cap * 7) // 10

    # ---- tk: prefer fully-resident weights (nk == 1 -> weights DMA'd once
    #      total); else the largest 128-multiple divisor of k_full whose
    #      double-buffered bf16 tiles fit in half the budget.
    def w_bytes(tk):
        return 2 * (d_pad * tk + tk * d_pad) * 2

    if w_bytes(k_full) <= budget // 2:
        tk = k_full
    else:
        tk = 128
        for cand in range(k_full, 0, -128):
            if k_full % cand == 0 and w_bytes(cand) <= budget // 2:
                tk = cand
                break

    # ---- tm: spend remaining budget on rows (bigger tm divides weight
    #      re-streaming and raises arithmetic intensity of the weight stream).
    small_bytes = 2 * 8 * tk * 4 + 3 * 2 * 8 * d_pad * 4
    per_row = 2 * d_pad * 2 + 2 * d_pad * 4 + tk * 4     # x(bf16,x2) + out(f32,x2) + h row
    tm_cap = (budget - w_bytes(tk) - small_bytes) // per_row
    tm_cap = max(ROW_ALIGN, min(1024, (tm_cap // ROW_ALIGN) * ROW_ALIGN))

    if n_rows <= tm_cap:
        tiles = 1
        if num_tc > 1 and n_rows >= 2 * ROW_ALIGN:
            tiles = min(num_tc, n_rows // ROW_ALIGN)     # feed every TensorCore
        tm = _round_up(-(-n_rows // tiles), ROW_ALIGN)
    else:
        tm = max(ROW_ALIGN, min(tm_cap, 256))
        best = None
        for cand in (1024, 768, 512, 384, 256, 192, 128, 64, 32, 16):
            if cand > tm_cap:
                continue
            key = (_round_up(n_rows, cand) - n_rows, -cand)   # min waste, then max tm
            if best is None or key < best:
                best, tm = key, cand

    return d_pad, k_full, tm, tk, vmem_cap


def ffn_kernel(x_ref, w1_ref, b1_ref, w2_ref, b2_ref, gamma_ref, beta_ref,
               o_ref, *, model_dim, ln_eps, need_mask):
    # Grid: (row tiles ["parallel"], inner_dim tiles ["arbitrary" reduction]).
    k = pl.program_id(1)
    nk = pl.num_programs(1)

    # linear_in chunk + ReLU (dropout == identity in eval mode); x already bf16.
    h = jnp.dot(x_ref[...], w1_ref[...], preferred_element_type=jnp.float32)
    h = jnp.maximum(h + b1_ref[...], 0.0)

    # linear_out chunk, accumulated directly in the resident f32 output block.
    contrib = jnp.dot(h.astype(jnp.bfloat16), w2_ref[...],
                      preferred_element_type=jnp.float32)

    @pl.when(k == 0)
    def _first():
        o_ref[...] = contrib

    @pl.when(k != 0)
    def _accum():
        o_ref[...] += contrib

    @pl.when(k == nk - 1)
    def _finalize():
        y = o_ref[...] + b2_ref[...]
        inv_d = jnp.float32(1.0 / model_dim)
        if need_mask:
            lane = lax.broadcasted_iota(jnp.int32, y.shape, 1)
            valid = lane < model_dim
            y = jnp.where(valid, y, 0.0)
        mean = jnp.sum(y, axis=-1, keepdims=True) * inv_d
        centered = y - mean
        if need_mask:
            centered = jnp.where(valid, centered, 0.0)
        # Two-pass variance (tighter than E[y^2] - E[y]^2).
        var = jnp.sum(centered * centered, axis=-1, keepdims=True) * inv_d
        out = centered * lax.rsqrt(var + ln_eps) * gamma_ref[...] + beta_ref[...]
        o_ref[...] = out.astype(o_ref.dtype)


def feed_forward_layer(x, w1, b1, w2, b2, gamma, beta, *, tm=None, tk=None):
    """x: (batch, seq, model_dim).  Returns (batch, seq, model_dim)."""
    batch, seq, model_dim = x.shape
    inner_dim = w1.shape[1]
    n_rows = batch * seq

    d_pad, k_full, tm_auto, tk_auto, vmem_cap = _tile_plan(n_rows, model_dim, inner_dim)
    tm = tm_auto if tm is None else tm
    tk = tk_auto if tk is None else tk
    r_pad = _round_up(n_rows, tm)
    k_pad = _round_up(k_full, tk)
    grid = (r_pad // tm, k_pad // tk)

    # ---- pad & cast operands.  All padding is ZERO (see invariant above). ----
    def pad2(a, rows, cols, dtype):
        a = a.astype(dtype)
        return jnp.pad(a, ((0, rows - a.shape[0]), (0, cols - a.shape[1])))

    x2d = pad2(x.reshape(n_rows, model_dim), r_pad, d_pad, jnp.bfloat16)
    w1p = pad2(w1, d_pad, k_pad, jnp.bfloat16)
    w2p = pad2(w2, k_pad, d_pad, jnp.bfloat16)
    b1p = pad2(b1.reshape(1, -1), 1, k_pad, jnp.float32)
    b2p = pad2(b2.reshape(1, -1), 1, d_pad, jnp.float32)
    gp = pad2(gamma.reshape(1, -1), 1, d_pad, jnp.float32)
    bp = pad2(beta.reshape(1, -1), 1, d_pad, jnp.float32)

    # ---- VMEM limit derived from the real footprint, capped by the chip. ----
    fp = _footprint_bytes(tm, tk, d_pad)
    vmem_limit = int(min(max(fp * 5 // 4 + (2 << 20), 4 << 20), (vmem_cap * 9) // 10))

    # ---- cost estimate (weights re-streamed once per row tile when nk>1). ----
    n_row_tiles = r_pad // tm
    nk = k_pad // tk
    w_restream = n_row_tiles if nk > 1 else 1
    cost = pl.CostEstimate(
        flops=4 * r_pad * d_pad * k_pad,
        transcendentals=r_pad,
        bytes_accessed=(x2d.size * 2
                        + (w1p.size + w2p.size) * 2 * w_restream
                        + (b1p.size + b2p.size + gp.size + bp.size) * 4
                        + r_pad * d_pad * 4),
    )

    kernel = functools.partial(ffn_kernel, model_dim=model_dim, ln_eps=LN_EPS,
                               need_mask=(d_pad != model_dim))

    out2d = pl.pallas_call(
        kernel,
        out_shape=jax.ShapeDtypeStruct((r_pad, d_pad), jnp.float32),
        grid=grid,
        in_specs=[
            pl.BlockSpec((tm, d_pad), lambda i, k: (i, 0)),   # x  (resident over k)
            pl.BlockSpec((d_pad, tk), lambda i, k: (0, k)),   # w1 (streamed over k)
            pl.BlockSpec((1, tk),     lambda i, k: (0, k)),   # b1
            pl.BlockSpec((tk, d_pad), lambda i, k: (k, 0)),   # w2 (streamed over k)
            pl.BlockSpec((1, d_pad),  lambda i, k: (0, 0)),   # b2
            pl.BlockSpec((1, d_pad),  lambda i, k: (0, 0)),   # gamma
            pl.BlockSpec((1, d_pad),  lambda i, k: (0, 0)),   # beta
        ],
        out_specs=pl.BlockSpec((tm, d_pad), lambda i, k: (i, 0)),
        compiler_params=pltpu.CompilerParams(
            dimension_semantics=("parallel", "arbitrary"),
            vmem_limit_bytes=vmem_limit,
        ),
        cost_estimate=cost,
    )(x2d, w1p, b1p, w2p, b2p, gp, bp)

    out = out2d[:n_rows, :model_dim].reshape(batch, seq, model_dim)
    return out.astype(x.dtype)


def init_params(key, model_dim, inner_dim):
    """Deterministic init mirroring nn.Linear's uniform(-1/sqrt(fan_in), 1/sqrt(fan_in))."""
    k1, k2, k3, k4 = jax.random.split(key, 4)
    bound1 = 1.0 / (model_dim ** 0.5)
    bound2 = 1.0 / (inner_dim ** 0.5)
    # Stored already transposed: (in_features, out_features).
    w1 = jax.random.uniform(k1, (model_dim, inner_dim), jnp.float32, -bound1, bound1)
    b1 = jax.random.uniform(k2, (inner_dim,), jnp.float32, -bound1, bound1)
    w2 = jax.random.uniform(k3, (inner_dim, model_dim), jnp.float32, -bound2, bound2)
    b2 = jax.random.uniform(k4, (model_dim,), jnp.float32, -bound2, bound2)
    gamma = jnp.ones((model_dim,), jnp.float32)   # nn.LayerNorm weight init
    beta = jnp.zeros((model_dim,), jnp.float32)   # nn.LayerNorm bias init
    return w1, b1, w2, b2, gamma, beta


if __name__ == "__main__":
    key = jax.random.PRNGKey(0)
    kx, kp = jax.random.split(key)

    batch, model_dim, inner_dim = 2, 32, 64
    x = jax.random.normal(kx, (batch, 1, model_dim), jnp.float32)
    params = init_params(kp, model_dim, inner_dim)

    out = jax.block_until_ready(feed_forward_layer(x, *params))

    # Pure-JAX reference (eval-mode dropout == identity), matching the kernel's
    # bf16-input / f32-accumulate matmuls.
    w1, b1, w2, b2, gamma, beta = params
    x2 = x.reshape(batch, model_dim)
    h = jnp.maximum(jnp.dot(x2.astype(jnp.bfloat16), w1.astype(jnp.bfloat16),
                            preferred_element_type=jnp.float32) + b1, 0.0)
    y = jnp.dot(h.astype(jnp.bfloat16), w2.astype(jnp.bfloat16),
                preferred_element_type=jnp.float32) + b2
    mu = jnp.mean(y, axis=-1, keepdims=True)
    var = jnp.mean((y - mu) ** 2, axis=-1, keepdims=True)
    ref = ((y - mu) / jnp.sqrt(var + LN_EPS)) * gamma + beta

    got = out.reshape(batch, model_dim)
    assert jnp.allclose(got, ref, atol=2e-3, rtol=2e-3), jnp.max(jnp.abs(got - ref))
    print("KERNEL_OK")
</pallas_src>

<mosaic_0001>
module attributes {stable_mosaic.version = 11 : i64} {
  func.func @ffn_kernel(%arg0: i32, %arg1: i32, %arg2: memref<16x128xbf16, #tpu.memory_space<vmem>>, %arg3: memref<128x128xbf16, #tpu.memory_space<vmem>>, %arg4: memref<1x128xf32, #tpu.memory_space<vmem>>, %arg5: memref<128x128xbf16, #tpu.memory_space<vmem>>, %arg6: memref<1x128xf32, #tpu.memory_space<vmem>>, %arg7: memref<1x128xf32, #tpu.memory_space<vmem>>, %arg8: memref<1x128xf32, #tpu.memory_space<vmem>>, %arg9: memref<16x128xf32, #tpu.memory_space<vmem>>) attributes {dimension_semantics = [#tpu.dimension_semantics<parallel>, #tpu.dimension_semantics<arbitrary>], iteration_bounds = array<i64: 1, 1>, scalar_prefetch = 0 : i64, scratch_operands = 0 : i64, tpu.core_type = #tpu.core_type<tc>, window_params = [{transform_indices = @transform_0, window_bounds = array<i64: 16, 128>}, {transform_indices = @transform_1, window_bounds = array<i64: 128, 128>}, {transform_indices = @transform_2, window_bounds = array<i64: 1, 128>}, {transform_indices = @transform_3, window_bounds = array<i64: 128, 128>}, {pipeline_mode = #tpu.pipeline_mode<synchronous>, transform_indices = @transform_4, window_bounds = array<i64: 1, 128>}, {pipeline_mode = #tpu.pipeline_mode<synchronous>, transform_indices = @transform_5, window_bounds = array<i64: 1, 128>}, {pipeline_mode = #tpu.pipeline_mode<synchronous>, transform_indices = @transform_6, window_bounds = array<i64: 1, 128>}, {transform_indices = @transform_7, window_bounds = array<i64: 16, 128>}]} {
    %c0 = arith.constant 0 : index
    %c0_0 = arith.constant 0 : index
    %0 = vector.load %arg2[%c0, %c0_0] : memref<16x128xbf16, #tpu.memory_space<vmem>>, vector<16x128xbf16>
    %c0_1 = arith.constant 0 : index
    %c0_2 = arith.constant 0 : index
    %1 = vector.load %arg3[%c0_1, %c0_2] : memref<128x128xbf16, #tpu.memory_space<vmem>>, vector<128x128xbf16>
    %cst = arith.constant dense<0.000000e+00> : vector<16x128xf32>
    %2 = tpu.matmul %0, %1, %cst {dimension_numbers = #tpu.dot_dimension_numbers<[1], [0], [0], [1], [0, 0, 1, 1], [], []>} : vector<16x128xbf16>, vector<128x128xbf16>, vector<16x128xf32> -> vector<16x128xf32>
    %c0_3 = arith.constant 0 : index
    %c0_4 = arith.constant 0 : index
    %3 = vector.load %arg4[%c0_3, %c0_4] : memref<1x128xf32, #tpu.memory_space<vmem>>, vector<1x128xf32>
    %4 = vector.broadcast %3 : vector<1x128xf32> to vector<16x128xf32>
    %5 = arith.addf %2, %4 : vector<16x128xf32>
    %cst_5 = arith.constant 0.000000e+00 : f32
    %6 = vector.broadcast %cst_5 : f32 to vector<16x128xf32>
    %7 = arith.maximumf %5, %6 : vector<16x128xf32>
    %8 = arith.truncf %7 : vector<16x128xf32> to vector<16x128xbf16>
    %c0_6 = arith.constant 0 : index
    %c0_7 = arith.constant 0 : index
    %9 = vector.load %arg5[%c0_6, %c0_7] : memref<128x128xbf16, #tpu.memory_space<vmem>>, vector<128x128xbf16>
    %cst_8 = arith.constant dense<0.000000e+00> : vector<16x128xf32>
    %10 = tpu.matmul %8, %9, %cst_8 {dimension_numbers = #tpu.dot_dimension_numbers<[1], [0], [0], [1], [0, 0, 1, 1], [], []>} : vector<16x128xbf16>, vector<128x128xbf16>, vector<16x128xf32> -> vector<16x128xf32>
    %c0_i32 = arith.constant 0 : i32
    %11 = arith.cmpi eq, %arg1, %c0_i32 : i32
    %12 = arith.extui %11 : i1 to i32
    %c0_i32_9 = arith.constant 0 : i32
    %13 = arith.cmpi ne, %12, %c0_i32_9 : i32
    scf.if %13 {
      %c0_14 = arith.constant 0 : index
      %c0_15 = arith.constant 0 : index
      %20 = vector.load %arg9[%c0_14, %c0_15] : memref<16x128xf32, #tpu.memory_space<vmem>>, vector<16x128xf32>
      tpu.vector_store %arg9[%c0_14, %c0_15], %10 {strides = array<i32>} : memref<16x128xf32, #tpu.memory_space<vmem>>, vector<16x128xf32>,
    } else {
    }
    %c0_i32_10 = arith.constant 0 : i32
    %14 = arith.cmpi ne, %arg1, %c0_i32_10 : i32
    %15 = arith.extui %14 : i1 to i32
    %c0_i32_11 = arith.constant 0 : i32
    %16 = arith.cmpi ne, %15, %c0_i32_11 : i32
    scf.if %16 {
      %c0_14 = arith.constant 0 : index
      %c0_15 = arith.constant 0 : index
      %20 = vector.load %arg9[%c0_14, %c0_15] : memref<16x128xf32, #tpu.memory_space<vmem>>, vector<16x128xf32>
      %21 = arith.addf %20, %10 : vector<16x128xf32>
      %c0_16 = arith.constant 0 : index
      %c0_17 = arith.constant 0 : index
      %22 = vector.load %arg9[%c0_16, %c0_17] : memref<16x128xf32, #tpu.memory_space<vmem>>, vector<16x128xf32>
      tpu.vector_store %arg9[%c0_16, %c0_17], %21 {strides = array<i32>} : memref<16x128xf32, #tpu.memory_space<vmem>>, vector<16x128xf32>,
    } else {
    }
    %c0_i32_12 = arith.constant 0 : i32
    %17 = arith.cmpi eq, %arg1, %c0_i32_12 : i32
    %18 = arith.extui %17 : i1 to i32
    %c0_i32_13 = arith.constant 0 : i32
    %19 = arith.cmpi ne, %18, %c0_i32_13 : i32
    scf.if %19 {
      %c0_14 = arith.constant 0 : index
      %c0_15 = arith.constant 0 : index
      %20 = vector.load %arg9[%c0_14, %c0_15] : memref<16x128xf32, #tpu.memory_space<vmem>>, vector<16x128xf32>
      %c0_16 = arith.constant 0 : index
      %c0_17 = arith.constant 0 : index
      %21 = vector.load %arg6[%c0_16, %c0_17] : memref<1x128xf32, #tpu.memory_space<vmem>>, vector<1x128xf32>
      %22 = vector.broadcast %21 : vector<1x128xf32> to vector<16x128xf32>
      %23 = arith.addf %20, %22 : vector<16x128xf32>
      %24 = tpu.iota {dimensions = array<i32: 1>} : vector<16x128xi32>
      %c32_i32 = arith.constant 32 : i32
      %25 = vector.broadcast %c32_i32 : i32 to vector<16x128xi32>
      %26 = arith.cmpi slt, %24, %25 : vector<16x128xi32>
      %cst_18 = arith.constant 0.000000e+00 : f32
      %27 = vector.broadcast %cst_18 : f32 to vector<16x128xf32>
      %28 = arith.select %26, %23, %27 : vector<16x128xi1>, vector<16x128xf32>
      %cst_19 = arith.constant dense<0.000000e+00> : vector<16xf32>
      %29 = vector.multi_reduction <add>, %28, %cst_19 [1] : vector<16x128xf32> to vector<16xf32>
      %30 = vector.shape_cast %29 : vector<16xf32> to vector<16x1xf32>
      %cst_20 = arith.constant 3.125000e-02 : f32
      %31 = vector.broadcast %cst_20 : f32 to vector<16x1xf32>
      %32 = arith.mulf %30, %31 : vector<16x1xf32>
      %33 = vector.broadcast %32 : vector<16x1xf32> to vector<16x128xf32>
      %34 = arith.subf %28, %33 : vector<16x128xf32>
      %cst_21 = arith.constant 0.000000e+00 : f32
      %35 = vector.broadcast %cst_21 : f32 to vector<16x128xf32>
      %36 = arith.select %26, %34, %35 : vector<16x128xi1>, vector<16x128xf32>
      %37 = arith.mulf %36, %36 : vector<16x128xf32>
      %cst_22 = arith.constant dense<0.000000e+00> : vector<16xf32>
      %38 = vector.multi_reduction <add>, %37, %cst_22 [1] : vector<16x128xf32> to vector<16xf32>
      %39 = vector.shape_cast %38 : vector<16xf32> to vector<16x1xf32>
      %cst_23 = arith.constant 3.125000e-02 : f32
      %40 = vector.broadcast %cst_23 : f32 to vector<16x1xf32>
      %41 = arith.mulf %39, %40 : vector<16x1xf32>
      %cst_24 = arith.constant 9.99999974E-6 : f32
      %42 = vector.broadcast %cst_24 : f32 to vector<16x1xf32>
      %43 = arith.addf %41, %42 : vector<16x1xf32>
      %44 = math.rsqrt %43 : vector<16x1xf32>
      %45 = vector.broadcast %44 : vector<16x1xf32> to vector<16x128xf32>
      %46 = arith.mulf %36, %45 : vector<16x128xf32>
      %c0_25 = arith.constant 0 : index
      %c0_26 = arith.constant 0 : index
      %47 = vector.load %arg7[%c0_25, %c0_26] : memref<1x128xf32, #tpu.memory_space<vmem>>, vector<1x128xf32>
      %48 = vector.broadcast %47 : vector<1x128xf32> to vector<16x128xf32>
      %49 = arith.mulf %46, %48 : vector<16x128xf32>
      %c0_27 = arith.constant 0 : index
      %c0_28 = arith.constant 0 : index
      %50 = vector.load %arg8[%c0_27, %c0_28] : memref<1x128xf32, #tpu.memory_space<vmem>>, vector<1x128xf32>
      %51 = vector.broadcast %50 : vector<1x128xf32> to vector<16x128xf32>
      %52 = arith.addf %49, %51 : vector<16x128xf32>
      %c0_29 = arith.constant 0 : index
      %c0_30 = arith.constant 0 : index
      %53 = vector.load %arg9[%c0_29, %c0_30] : memref<16x128xf32, #tpu.memory_space<vmem>>, vector<16x128xf32>
      tpu.vector_store %arg9[%c0_29, %c0_30], %52 {strides = array<i32>} : memref<16x128xf32, #tpu.memory_space<vmem>>, vector<16x128xf32>,
    } else {
    }
    return
  }
  func.func @transform_0(%arg0: i32, %arg1: i32) -> (i32, i32) {
    %c0_i32 = arith.constant 0 : i32
    %c0_i32_0 = arith.constant 0 : i32
    return %arg0, %c0_i32 : i32, i32
  }
  func.func @transform_1(%arg0: i32, %arg1: i32) -> (i32, i32) {
    %c0_i32 = arith.constant 0 : i32
    %c0_i32_0 = arith.constant 0 : i32
    return %c0_i32, %arg1 : i32, i32
  }
  func.func @transform_2(%arg0: i32, %arg1: i32) -> (i32, i32) {
    %c0_i32 = arith.constant 0 : i32
    %c0_i32_0 = arith.constant 0 : i32
    return %c0_i32, %arg1 : i32, i32
  }
  func.func @transform_3(%arg0: i32, %arg1: i32) -> (i32, i32) {
    %c0_i32 = arith.constant 0 : i32
    %c0_i32_0 = arith.constant 0 : i32
    return %arg1, %c0_i32 : i32, i32
  }
  func.func @transform_4(%arg0: i32, %arg1: i32) -> (i32, i32) {
    %c0_i32 = arith.constant 0 : i32
    %c0_i32_0 = arith.constant 0 : i32
    %c0_i32_1 = arith.constant 0 : i32
    return %c0_i32, %c0_i32_0 : i32, i32
  }
  func.func @transform_5(%arg0: i32, %arg1: i32) -> (i32, i32) {
    %c0_i32 = arith.constant 0 : i32
    %c0_i32_0 = arith.constant 0 : i32
    %c0_i32_1 = arith.constant 0 : i32
    return %c0_i32, %c0_i32_0 : i32, i32
  }
  func.func @transform_6(%arg0: i32, %arg1: i32) -> (i32, i32) {
    %c0_i32 = arith.constant 0 : i32
    %c0_i32_0 = arith.constant 0 : i32
    %c0_i32_1 = arith.constant 0 : i32
    return %c0_i32, %c0_i32_0 : i32, i32
  }
  func.func @transform_7(%arg0: i32, %arg1: i32) -> (i32, i32) {
    %c0_i32 = arith.constant 0 : i32
    %c0_i32_0 = arith.constant 0 : i32
    return %arg0, %c0_i32 : i32, i32
  }
}

</mosaic_0001>

<bundles_post_ra>
// kernel: tpu_custom_call.1
= control target key start
LH: loop header
LB: loop body
LE: loop exit
PB: predicated region body
PF: predicated region fallthrough
CT: control target
= control target key end

     0   :  { %12 = vsyncpa [#allocation3], 0  ;;  %s632_s0 = inlined_call_operand.hbm [shape: bf16[16,128], index: 0, kind: input, shape index: {}]   ;;  %s633_s1 = inlined_call_operand.hbm [shape: bf16[128,128], index: 1, kind: input, shape index: {}]   ;;  %s634_s2 = inlined_call_operand.vmem [shape: f32[1,128], index: 2, kind: input, shape index: {}]   ;;  %s635_s3 = inlined_call_operand.hbm [shape: bf16[128,128], index: 3, kind: input, shape index: {}]   ;;  %s636_s4 = inlined_call_operand.vmem [shape: f32[1,128], index: 4, kind: input, shape index: {}]   ;;  %s637_s5 = inlined_call_operand.vmem [shape: f32[1,128], index: 5, kind: input, shape index: {}]   ;;  %s638_s6 = inlined_call_operand.vmem [shape: f32[1,128], index: 6, kind: input, shape index: {}]   ;;  %s639_s7 = inlined_call_operand.hbm [shape: f32[16,128], index: 7, kind: output, shape index: {}]  }
   0x1   :  { %13 = vsyncpa [#allocation6], 0 }
   0x2   :  { %14 = vsyncpa [#allocation4], 0  ;;  %s32_s26 = sshll.u32 %s633_s1, 4  ;;  %s556_s27 = smov [#allocation5]   ;;  %s33_s26 = int_to_ptr.hbm [resolvable:$true] %s32_s26 }
   0x3   :  { %s34_s28 = sshll.u32 %s556_s27, 4  ;;  %s19_s8 = sshll.u32 %s632_s0, 4  ;;  %s35_s28 = int_to_ptr.vmem [resolvable:$true] %s34_s28  ;;  %s20_s8 = int_to_ptr.hbm [resolvable:$true] %s19_s8 }
   0x4   :  { %s557_s9 = smov 64   ;;  %s558_s10 = smov 4  }
   0x5   :  { %40 = dma.hbm_to_vmem [thread:$0]  %s33_s26, 1024, %s35_s28, [#allocation6], %s557_s9, %s557_s9, %s558_s10  }
   0x6   :  { %s559_s11 = smov [#allocation2]   ;;  %s47_s15 = sshll.u32 %s635_s3, 4  ;;  %s48_s15 = int_to_ptr.hbm [resolvable:$true] %s47_s15 }
   0x7   :  { %s21_s12 = sshll.u32 %s559_s11, 4  ;;  %s560_s1 = smov [#allocation7]   ;;  %s22_s12 = int_to_ptr.vmem [resolvable:$true] %s21_s12 }
   0x8   :  { %27 = dma.hbm_to_vmem [thread:$0]  %s20_s8, 128, %s22_s12, [#allocation3], %s557_s9, %s557_s9, %s558_s10  }
   0x9   :  { %s49_s16 = sshll.u32 %s560_s1, 4  ;;  %s50_s16 = int_to_ptr.vmem [resolvable:$true] %s49_s16 }
   0xa   :  { %55 = dma.hbm_to_vmem [thread:$0]  %s48_s15, 1024, %s50_s16, [#allocation6], %s557_s9, %s557_s9, %s558_s10  }
   0xb   :  { %550 = dma.done.wait [#allocation3], 128  }
   0xc   :  { %551 = vsyncadd [#allocation3], 4294967168 }
   0xd   :  { %552 = dma.done.wait [#allocation6], 2048  }
   0xe   :  { %553 = vsyncadd [#allocation6], 4294965248  ;;  %v429_v0 = vld [vmem:[#allocation5 + $0x38] sm:$0xff]  ;;  %v428_v1 = vld [vmem:[#allocation5 + $0x30] sm:$0xff]  ;;  %v272_v25 = vlaneseq  ;;  %s339_s24 = sshll.u32 %s639_s7, 4  ;;  %s563_s25 = smov 8   ;;  %s340_s24 = int_to_ptr.hbm [resolvable:$true] %s339_s24 }
   0xf   :  { %150 = vmatpush.bf16.msra.mxu0 %v429_v0  ;;  %v437_v2 = vld [vmem:[#allocation7 + $0x38] sm:$0xff]  ;;  %v436_v3 = vld [vmem:[#allocation7 + $0x30] sm:$0xff]  ;;  %v427_v4 = vld [vmem:[#allocation5 + $0x28] sm:$0xff] }
  0x10   :  { %231 = vmatpush.bf16.msra.mxu1 %v437_v2  ;;  %v435_v5 = vld [vmem:[#allocation7 + $0x28] sm:$0xff]  ;;  %v426_v6 = vld [vmem:[#allocation5 + $0x20] sm:$0xff]  ;;  %v425_v8 = vld [vmem:[#allocation5 + $0x18] sm:$0xff]  ;;  %v273_v26 = vand.u32 127, %v272_v25 }
  0x11   :  { %v434_v7 = vld [vmem:[#allocation7 + $0x20] sm:$0xff]  ;;  %v424_v9 = vld [vmem:[#allocation5 + $0x10] sm:$0xff]  ;;  %v423_v10 = vld [vmem:[#allocation5 + $0x8] sm:$0xff] }
  0x12   :  { %v422_v11 = vld [vmem:[#allocation5] sm:$0xff]  ;;  %v421_v12 = vld [vmem:[#allocation2] sm:$0xff]  ;;  %v432_v14 = vld [vmem:[#allocation7 + $0x10] sm:$0xff]  ;;  %vm274_vm0 = vcmp.lt.s32.totalorder %v273_v26, 32 }
  0x13   :  { %151 = vmatpush.bf16.msra.mxu0 %v428_v1  ;;  %v433_v13 = vld [vmem:[#allocation7 + $0x18] sm:$0xff]  ;;  %v431_v15 = vld [vmem:[#allocation7 + $0x8] sm:$0xff]  ;;  %v430_v16 = vld [vmem:[#allocation7] sm:$0xff] }
  0x14   :  { %232 = vmatpush.bf16.msra.mxu1 %v436_v3  ;;  %v446_v18 = vld [vmem:[%s634_s2] ss:$0 sm:$0xff] }
  0x15   :  { %v447_v27 = vld [vmem:[%s636_s4] ss:$0 sm:$0xff] }
  0x16   :  { %v448_v58 = vld [vmem:[%s637_s5] ss:$0 sm:$0xff]  ;;  %s561_s5 = smov [#allocation8]  }
  0x17   :  { %152 = vmatpush.bf16.msra.mxu0 %v427_v4  ;;  %v449_v61 = vld [vmem:[%s638_s6] ss:$0 sm:$0xff]  ;;  %s337_s21 = sshll.u32 %s561_s5, 4  ;;  %s562_s6 = smov 128   ;;  %s338_s21 = int_to_ptr.vmem [resolvable:$true] %s337_s21 }
  0x18   :  { %233 = vmatpush.bf16.msra.mxu1 %v435_v5 }
  0x1b   :  { %153 = vmatpush.bf16.msra.mxu0 %v426_v6 }
  0x1c   :  { %234 = vmatpush.bf16.msra.mxu1 %v434_v7 }
  0x1f   :  { %154 = vmatpush.bf16.msra.mxu0 %v425_v8 }
  0x20   :  { %235 = vmatpush.bf16.msra.mxu1 %v433_v13 }
  0x23   :  { %155 = vmatpush.bf16.msra.mxu0 %v424_v9 }
  0x24   :  { %236 = vmatpush.bf16.msra.mxu1 %v432_v14 }
  0x27   :  { %156 = vmatpush.bf16.msra.mxu0 %v423_v10 }
  0x28   :  { %237 = vmatpush.bf16.msra.mxu1 %v431_v15 }
  0x2b   :  { %157 = vmatpush.bf16.msra.mxu0 %v422_v11 }
  0x2c   :  { %238 = vmatpush.bf16.msra.mxu1 %v430_v16 }
  0x2e   :  { %158 = vmatmul.bf16.vlgmr.msra.gmra.mxu0 %v421_v12 }
  0xab   :  { %v159_v17 = vpop.f32.mrf.mxu0 }
  0xac   :  { %v160_v19 = vadd.f32 %v446_v18, %v159_v17 }
  0xae   :  { %v164_v22 = vmax.f32 %v160_v19, 0.0 }
  0xb3   :  { %v161_v20 = vpop.f32.mrf.mxu0 }
  0xb4   :  { %v162_v21 = vadd.f32 %v446_v18, %v161_v20 }
  0xb6   :  { %v165_v23 = vmax.f32 %v162_v21, 0.0 }
  0xb8   :  { %v166_v24 = vpack.c.bf16 %v165_v23, %v164_v22 }
  0xba   :  { %239 = vmatmul.bf16.vlgmr.msra.gmra.mxu1 %v166_v24 }
 0x137   :  { %v240_v28 = vpop.f32.mrf.mxu1 }
 0x138   :  { %v270_v29 = vadd.f32 %v447_v27, %v240_v28 }
 0x13a   :  { %v275_v30 = vsel %vm274_vm0, %v270_v29, 0.0 }
 0x13b   :  { %277 = vadd.xlane.f32.xlu0 %v275_v30 }
 0x13f   :  { %v242_v31 = vpop.f32.mrf.mxu1 }
 0x140   :  { %v271_v32 = vadd.f32 %v447_v27, %v242_v31 }
 0x142   :  { %v276_v33 = vsel %vm274_vm0, %v271_v32, 0.0 }
 0x143   :  { %279 = vadd.xlane.f32.xlu0 %v276_v33 }
 0x1ae   :  { %v278_v34 = vpop.xlane.xlu0 %277 }
 0x1af   :  { %v281_v35 = vmul.f32 0.03125, %v278_v34 }
 0x1b1   :  { %v283_v36 = vsub.f32 %v275_v30, %v281_v35 }
 0x1b3   :  { %v285_v37 = vsel %vm274_vm0, %v283_v36, 0.0 }
 0x1b4   :  { %v287_v38 = vmul.f32 %v285_v37, %v285_v37 }
 0x1b6   :  { %289 = vadd.xlane.f32.xlu1 %v287_v38  ;;  %v280_v39 = vpop.xlane.xlu0 %279 }
 0x1b7   :  { %v282_v40 = vmul.f32 0.03125, %v280_v39 }
 0x1b9   :  { %v284_v41 = vsub.f32 %v276_v33, %v282_v40 }
 0x1bb   :  { %v286_v42 = vsel %vm274_vm0, %v284_v41, 0.0 }
 0x1bc   :  { %v288_v43 = vmul.f32 %v286_v42, %v286_v42 }
 0x1be   :  { %291 = vadd.xlane.f32.xlu1 %v288_v43 }
 0x229   :  { %v290_v44 = vpop.xlane.xlu1 %289 }
 0x22a   :  { %v293_v45 = vmul.f32 0.03125, %v290_v44 }
 0x22c   :  { %v295_v46 = vadd.f32 1e-05, %v293_v45 }
 0x22e   :  { %450 = vrsqrt.f32 %v295_v46  ;;  %vm303_vm2 = vweird.f32 %v295_v46 }
 0x231   :  { %v292_v47 = vpop.xlane.xlu1 %291 }
 0x232   :  { %v294_v48 = vmul.f32 0.03125, %v292_v47 }
 0x234   :  { %v451_v49 = vpop.eup %450  ;;  %v296_v50 = vadd.f32 1e-05, %v294_v48 }
 0x235   :  { %v298_v51 = vmul.f32 %v451_v49, %v295_v46  ;;  %vm304_vm1 = vweird.f32 %v451_v49 }
 0x236   :  { %452 = vrsqrt.f32 %v296_v50  ;;  %vm305_vm3 = vmor %vm303_vm2, %vm304_vm1  ;;  %vm313_vm5 = vweird.f32 %v296_v50 }
 0x237   :  { %v299_v52 = vmul.f32 %v451_v49, %v298_v51 }
 0x239   :  { %v300_v53 = vmul.f32 0.5, %v299_v52 }
 0x23b   :  { %v301_v54 = vsub.f32 1.5, %v300_v53 }
 0x23c   :  { %v453_v55 = vpop.eup %452 }
 0x23d   :  { %v302_v56 = vmul.f32 %v451_v49, %v301_v54  ;;  %v308_v57 = vmul.f32 %v453_v55, %v296_v50  ;;  %vm314_vm4 = vweird.f32 %v453_v55 }
 0x23e   :  { %vm315_vm6 = vmor %vm313_vm5, %vm314_vm4 }
 0x23f   :  { %v306_v59 = vsel %vm305_vm3, %v451_v49, %v302_v56  ;;  %v309_v60 = vmul.f32 %v453_v55, %v308_v57 }
 0x240   :  { %v317_v62 = vmul.f32 %v306_v59, %v285_v37 }
 0x241   :  { %v310_v63 = vmul.f32 0.5, %v309_v60 }
 0x242   :  { %v323_v0 = vmul.f32 %v448_v58, %v317_v62 }
 0x243   :  { %v311_v1 = vsub.f32 1.5, %v310_v63 }
 0x244   :  { %v329_v2 = vadd.f32 %v449_v61, %v323_v0 }
 0x245   :  { %v312_v3 = vmul.f32 %v453_v55, %v311_v1 }
 0x246   :  { %331 = vst [vmem:[#allocation8] sm:$0xff] %v329_v2 }
 0x247   :  { %v316_v4 = vsel %vm315_vm6, %v453_v55, %v312_v3 }
 0x248   :  { %v318_v5 = vmul.f32 %v316_v4, %v286_v42 }
 0x24a   :  { %v324_v6 = vmul.f32 %v448_v58, %v318_v5 }
 0x24c   :  { %v330_v7 = vadd.f32 %v449_v61, %v324_v6 }
 0x24e   :  { %332 = vst [vmem:[#allocation8 + $0x8] sm:$0xff] %v330_v7 }
 0x24f   :  { %345 = dma.vmem_to_hbm [thread:$0]  %s338_s21, 256, %s340_s24, [#allocation4], %s562_s6, %s562_s6, %s563_s25  }
 0x250   :  { %554 = dma.done.wait [#allocation4], 256  }
 0x251   :  { %555 = vsyncadd [#allocation4], 4294967040 }
 0x252   :  { %350 = vsyncpa [#allocation3], 1 }
 0x253   :  { %351 = vsyncpa [#allocation6], 1 }
 0x254   :  { %352 = vsyncpa [#allocation4], 1 }

</bundles_post_ra>
